<compile_context>
chip_gen: v7x
topology: tpu7x:2x2x1
jax: 0.10.0
libtpu: 0.0.40
codegen_flags: <defaults>
</compile_context>

<pallas_src>
import math
from functools import partial

import jax
import jax.numpy as jnp
from jax.experimental import pallas as pl
from jax.experimental.pallas import tpu as pltpu

BN_EPS = 1e-5
LANE = 128
SUBLANE_BF16 = 16          # bf16 native sublane tile height


def _round_up(x, m):
    return ((x + m - 1) // m) * m


# ----------------------------------------------------------------------------
# Hardware-aware budgets (best-effort; conservative fallbacks keep it correct
# on any generation).
# ----------------------------------------------------------------------------
def _vmem_capacity_bytes():
    try:
        info = pltpu.get_tpu_info()
        cap = int(getattr(info, "vmem_capacity_bytes"))
        if cap > 0:
            return cap
    except Exception:
        pass
    return 64 * 1024 * 1024            # conservative default (v7x per-TC VMEM)


def _num_tensorcores():
    try:
        info = pltpu.get_tpu_info()
    except Exception:
        return 1
    for attr in ("num_cores", "core_count", "num_tensorcores", "tensorcore_count"):
        try:
            v = int(getattr(info, attr))
            if 1 <= v <= 8:
                return v
        except Exception:
            continue
    return 1


def _fused_vmem_need(b_pad, dims_pad):
    """Rough VMEM footprint (bytes) of the fused whole-stack kernel."""
    d0 = dims_pad[0]
    max_dim = max(dims_pad)
    x_bytes = b_pad * d0 * 2
    out_bytes = b_pad * dims_pad[-1] * 4
    w_bytes = sum(dims_pad[i] * dims_pad[i + 1] * 2 for i in range(len(dims_pad) - 1))
    vec_bytes = 2 * d0 * 4 + sum((3 * dims_pad[i] + dims_pad[i + 1]) * 4
                                 for i in range(len(dims_pad) - 1))
    live_bytes = 3 * b_pad * max_dim * 4     # compiler-held f32 intermediates (estimate)
    return 2 * (x_bytes + out_bytes) + w_bytes + vec_bytes + live_bytes


def _tiled_vmem_need(tile_b, ni_pad, no_pad):
    x_tile = tile_b * ni_pad * 2             # bf16 input tile
    y_tile = tile_b * no_pad * 2             # bf16 output tile
    w_res = ni_pad * no_pad * 2 + no_pad * 4
    stats = 2 * 8 * no_pad * 4
    return 2 * (x_tile + y_tile) + 2 * (w_res + stats)


def _choose_tile_b(B, max_dim_pad, data_budget):
    """Largest bf16-friendly batch tile that fits the VMEM budget without
    pathological padding (<= ~6% waste); falls back to the largest fitting one."""
    b16 = _round_up(B, SUBLANE_BF16)
    best = None
    for t in (2048, 1024, 512, 256, 128, 64, 32, 16):
        if t > b16:
            continue
        need = _tiled_vmem_need(t, max_dim_pad, max_dim_pad)
        if need > data_budget:
            continue
        if best is None:
            best = t
        waste = (_round_up(B, t) - B) / max(B, 1)
        if waste <= 1.0 / 16.0:
            return t
    return best if best is not None else SUBLANE_BF16


# ----------------------------------------------------------------------------
# Fused path: whole stack in one VMEM-resident kernel.
# ----------------------------------------------------------------------------
def _make_fused_kernel(n_blocks, dims_pad, n_emb, n_cont, b_true, b_pad):
    """Stem BN + every (BN -> Linear -> ReLU?) block in a single kernel.

    The full (padded) batch is VMEM resident, so each layer's full-batch
    BatchNorm statistics are computed in-kernel and folded into a per-column
    affine right before the MXU matmul.  No intermediate HBM traffic.
    """
    d0_pad = dims_pad[0]
    inv_b = 1.0 / float(b_true)

    def kernel(*refs):
        it = iter(refs)
        x_ref = next(it)
        stem_g_ref = next(it)
        stem_b_ref = next(it)
        blocks = [(next(it), next(it), next(it), next(it)) for _ in range(n_blocks)]
        out_ref = next(it)

        # Row-validity mask: keeps the batch-padding rows out of the statistics.
        if b_pad != b_true:
            row = jax.lax.broadcasted_iota(jnp.int32, (b_pad, 1), 0)
            row_valid = row < b_true
        else:
            row_valid = None

        x = x_ref[...].astype(jnp.float32)       # [b_pad, d0_pad]; pad rows/cols are 0

        # ---- stem-input column stats (single in-VMEM reduce, biased variance) ----
        mean0 = jnp.sum(x, axis=0, keepdims=True) * inv_b
        var0 = jnp.maximum(jnp.sum(x * x, axis=0, keepdims=True) * inv_b
                           - mean0 * mean0, 0.0)

        # ---- stem BN touches only the continuous columns [n_emb, n_emb+n_cont) ----
        col = jax.lax.broadcasted_iota(jnp.int32, (1, d0_pad), 1)
        is_cont = jnp.logical_and(col >= n_emb, col < n_emb + n_cont)
        a_s = jnp.where(is_cont, stem_g_ref[...] * jax.lax.rsqrt(var0 + BN_EPS), 1.0)
        c_s = jnp.where(is_cont, stem_b_ref[...] - a_s * mean0, 0.0)

        # Exact stats of the stem output (affine image of the input columns).
        mean_cur = a_s * mean0 + c_s
        var_cur = a_s * a_s * var0
        pre_a, pre_c = a_s, c_s
        cur = x

        for i in range(n_blocks):
            g_ref, be_ref, w_ref, bias_ref = blocks[i]
            is_last = i == n_blocks - 1

            # Fold this block's BN (plus any upstream affine) into one per-column affine.
            a_bn = g_ref[...] * jax.lax.rsqrt(var_cur + BN_EPS)
            c_bn = be_ref[...] - a_bn * mean_cur
            a = a_bn * pre_a
            c = a_bn * pre_c + c_bn

            xn = (cur * a + c).astype(jnp.bfloat16)
            y = jnp.dot(xn, w_ref[...], preferred_element_type=jnp.float32) + bias_ref[...]

            if is_last:
                out_ref[...] = y.astype(out_ref.dtype)
            else:
                y = jnp.maximum(y, 0.0)
                if row_valid is not None:
                    y = jnp.where(row_valid, y, 0.0)     # keep pad rows out of next stats
                mean_cur = jnp.sum(y, axis=0, keepdims=True) * inv_b
                var_cur = jnp.maximum(jnp.sum(y * y, axis=0, keepdims=True) * inv_b
                                      - mean_cur * mean_cur, 0.0)
                pre_a = jnp.ones_like(mean_cur)
                pre_c = jnp.zeros_like(mean_cur)
                cur = y

    return kernel


def _fused_call(x_pad_bf16, stem_g, stem_b, padded_blocks, *, dims_pad, n_emb,
                n_cont, b_true, b_pad, vmem_limit):
    n_blocks = len(padded_blocks)
    kernel = _make_fused_kernel(n_blocks, dims_pad, n_emb, n_cont, b_true, b_pad)

    def full_spec(shape):
        nd = len(shape)
        return pl.BlockSpec(shape, lambda i, nd=nd: (0,) * nd)

    in_specs = [full_spec(x_pad_bf16.shape), full_spec(stem_g.shape), full_spec(stem_b.shape)]
    args = [x_pad_bf16, stem_g, stem_b]
    for (g, be, w, bias) in padded_blocks:
        for arr in (g, be, w, bias):
            in_specs.append(full_spec(arr.shape))
            args.append(arr)

    out_shape = jax.ShapeDtypeStruct((b_pad, dims_pad[-1]), jnp.float32)
    out_specs = full_spec((b_pad, dims_pad[-1]))

    return pl.pallas_call(
        kernel,
        grid=(1,),
        in_specs=in_specs,
        out_specs=out_specs,
        out_shape=out_shape,
        compiler_params=pltpu.CompilerParams(
            dimension_semantics=("arbitrary",),
            vmem_limit_bytes=int(vmem_limit)),
    )(*args)


# ----------------------------------------------------------------------------
# Tiled path: one pipelined pallas_call per LinearBlock, bf16 activation stream,
# per-core partial BN-stat accumulators (v7x megacore safe).
# ----------------------------------------------------------------------------
def _make_tiled_kernel(apply_relu, emit_stats, tile_b, b_true, b_pad,
                       n_cores, tiles_per_core):
    has_row_pad = b_pad != b_true
    n_valid_last = b_true - (b_pad - tile_b)   # valid rows in the globally-last tile

    def kernel(x_ref, w_ref, b_ref, y_ref, *stat_refs):
        # bf16 activations in / out; matmul accumulates in f32.
        y = jnp.dot(x_ref[...], w_ref[...], preferred_element_type=jnp.float32) + b_ref[...]
        if apply_relu:
            y = jnp.maximum(y, 0.0)
        # Batch-padding rows carry finite garbage in y; they are excluded from the
        # statistics below and sliced off by the wrapper, so y itself is not masked.
        y_ref[...] = y.astype(y_ref.dtype)

        if emit_stats:
            sum_ref, sq_ref = stat_refs

            @pl.when(pl.program_id(1) == 0)
            def _init():
                sum_ref[...] = jnp.zeros_like(sum_ref)
                sq_ref[...] = jnp.zeros_like(sq_ref)

            if has_row_pad:
                is_last = jnp.logical_and(pl.program_id(0) == n_cores - 1,
                                          pl.program_id(1) == tiles_per_core - 1)

                @pl.when(jnp.logical_not(is_last))
                def _acc_full():
                    sum_ref[...] += jnp.sum(y, axis=0, keepdims=True)
                    sq_ref[...] += jnp.sum(y * y, axis=0, keepdims=True)

                @pl.when(is_last)
                def _acc_masked():
                    rowi = jax.lax.broadcasted_iota(jnp.int32, y.shape, 0)
                    ym = jnp.where(rowi < n_valid_last, y, 0.0)
                    sum_ref[...] += jnp.sum(ym, axis=0, keepdims=True)
                    sq_ref[...] += jnp.sum(ym * ym, axis=0, keepdims=True)
            else:
                sum_ref[...] += jnp.sum(y, axis=0, keepdims=True)
                sq_ref[...] += jnp.sum(y * y, axis=0, keepdims=True)

    return kernel


def _linear_block_tiled(x, w_bf16, bias_f32, *, apply_relu, emit_stats,
                        tile_b, b_true, n_cores, vmem_limit):
    """One folded LinearBlock over the padded bf16 activation stream."""
    b_pad, ni_pad = int(x.shape[0]), int(x.shape[1])
    no_pad = int(w_bf16.shape[1])
    n_tiles = b_pad // tile_b
    if n_cores > 1 and n_tiles % n_cores != 0:
        n_cores = 1
    tiles_per_core = n_tiles // n_cores

    kernel = _make_tiled_kernel(apply_relu, emit_stats, tile_b, b_true, b_pad,
                                n_cores, tiles_per_core)

    x_spec = pl.BlockSpec((tile_b, ni_pad), lambda c, t: (c * tiles_per_core + t, 0))
    w_spec = pl.BlockSpec((ni_pad, no_pad), lambda c, t: (0, 0))
    b_spec = pl.BlockSpec((1, no_pad), lambda c, t: (0, 0))
    y_spec = pl.BlockSpec((tile_b, no_pad), lambda c, t: (c * tiles_per_core + t, 0))
    y_shape = jax.ShapeDtypeStruct((b_pad, no_pad), jnp.bfloat16)

    if emit_stats:
        # One (8, no_pad) sublane-padded accumulator block per core -> no cross-core
        # revisits, so the leading axis can be "parallel" (v7x megacore).
        stat_spec = pl.BlockSpec((8, no_pad), lambda c, t: (c, 0))
        stat_shape = jax.ShapeDtypeStruct((8 * n_cores, no_pad), jnp.float32)
        out_specs = (y_spec, stat_spec, stat_spec)
        out_shape = (y_shape, stat_shape, stat_shape)
        dims = ("parallel", "arbitrary")
    else:
        out_specs = y_spec
        out_shape = y_shape
        dims = ("parallel", "parallel")

    out = pl.pallas_call(
        kernel,
        grid=(n_cores, tiles_per_core),
        in_specs=[x_spec, w_spec, b_spec],
        out_specs=out_specs,
        out_shape=out_shape,
        compiler_params=pltpu.CompilerParams(
            dimension_semantics=dims,
            vmem_limit_bytes=int(vmem_limit)),
    )(x, w_bf16, bias_f32)

    if emit_stats:
        y, s, sq = out
        s = jnp.sum(s.reshape(n_cores, 8, no_pad)[:, 0, :], axis=0)
        sq = jnp.sum(sq.reshape(n_cores, 8, no_pad)[:, 0, :], axis=0)
        return y, s, sq
    return out, None, None


# ----------------------------------------------------------------------------
# Forward pass
# ----------------------------------------------------------------------------
def tabular_forward(x_cat, x_cont, params, *, force_tiled=False, tile_b=None):
    """Forward pass of TabularModel (training-mode BN, dropout p=0)."""
    emb_ws = params["emb_ws"]
    n_emb = sum(int(w.shape[1]) for w in emb_ws)
    x_cont = x_cont.astype(jnp.float32)
    n_cont = int(x_cont.shape[1])
    B = int(x_cat.shape[0]) if emb_ws else int(x_cont.shape[0])

    blocks = params["blocks"]
    n_blocks = len(blocks)
    n_out = int(blocks[-1][2].shape[1])
    D0 = n_emb + n_cont
    dims = [D0] + [int(b[2].shape[1]) for b in blocks]
    dims_pad = [_round_up(d, LANE) for d in dims]
    d0_pad = dims_pad[0]

    # ---- hardware-aware budgets ----
    cap = _vmem_capacity_bytes()
    data_budget = cap // 2
    n_cores = _num_tensorcores()

    # ---- choose execution path and batch padding ----
    b_pad_fused = _round_up(B, SUBLANE_BF16)
    fused_need = _fused_vmem_need(b_pad_fused, dims_pad)
    use_fused = (not force_tiled) and fused_need <= data_budget

    if use_fused:
        b_pad = b_pad_fused
    else:
        if tile_b is None:
            tile_b = _choose_tile_b(B, max(dims_pad), data_budget)
        else:
            tile_b = max(SUBLANE_BF16, _round_up(int(tile_b), SUBLANE_BF16))
        b_pad = _round_up(B, tile_b)

    # ---- assemble the padded stem input directly (no separate x_full copy) ----
    # TODO(synk): for very large batches, gather the embeddings in-kernel from
    #             VMEM-resident tables with scalar-prefetched x_cat instead of
    #             materializing the concatenated input in HBM.
    pieces = [jnp.take(w, x_cat[:, i], axis=0) for i, w in enumerate(emb_ws)]
    if n_cont:
        pieces.append(x_cont)
    if d0_pad > D0:
        pieces.append(jnp.zeros((B, d0_pad - D0), jnp.float32))
    x_pad = pieces[0] if len(pieces) == 1 else jnp.concatenate(pieces, axis=1)
    if b_pad > B:
        x_pad = jnp.concatenate(
            [x_pad, jnp.zeros((b_pad - B, d0_pad), jnp.float32)], axis=0)

    # ======================= fused single-kernel path =======================
    if use_fused:
        stem_g = jnp.ones((d0_pad,), jnp.float32)
        stem_b = jnp.zeros((d0_pad,), jnp.float32)
        if n_cont:
            stem_g = stem_g.at[n_emb:n_emb + n_cont].set(params["stem_gamma"])
            stem_b = stem_b.at[n_emb:n_emb + n_cont].set(params["stem_beta"])
        stem_g = stem_g.reshape(1, d0_pad)
        stem_b = stem_b.reshape(1, d0_pad)

        padded_blocks = []
        for i, (g, b, w, bias) in enumerate(blocks):
            ni, no = int(w.shape[0]), int(w.shape[1])
            ni_pad, no_pad = dims_pad[i], dims_pad[i + 1]
            g_p = jnp.pad(g, (0, ni_pad - ni), constant_values=1.0).reshape(1, ni_pad)
            be_p = jnp.pad(b, (0, ni_pad - ni)).reshape(1, ni_pad)
            w_p = jnp.pad(w, ((0, ni_pad - ni), (0, no_pad - no))).astype(jnp.bfloat16)
            bias_p = jnp.pad(bias, (0, no_pad - no)).reshape(1, no_pad)
            padded_blocks.append((g_p, be_p, w_p, bias_p))

        vmem_limit = min(cap - cap // 8, fused_need + (16 << 20))
        y = _fused_call(x_pad.astype(jnp.bfloat16), stem_g, stem_b, padded_blocks,
                        dims_pad=dims_pad, n_emb=n_emb, n_cont=n_cont,
                        b_true=B, b_pad=b_pad, vmem_limit=vmem_limit)
        return y[:B, :n_out]

    # ============================ tiled path ================================
    # Single fused sum / sum-of-squares pass over the padded stem input
    # (pad rows/cols are zero, so dividing by the true B is exact).
    s0 = jnp.sum(x_pad, axis=0)
    sq0 = jnp.sum(x_pad * x_pad, axis=0)
    mean0 = s0[:D0] / B
    var0 = jnp.maximum(sq0[:D0] / B - mean0 * mean0, 0.0)   # biased, like torch

    # Stem BN on the continuous columns as a per-feature affine.
    a_stem = jnp.ones((D0,), jnp.float32)
    c_stem = jnp.zeros((D0,), jnp.float32)
    if n_cont:
        a_c = params["stem_gamma"] * jax.lax.rsqrt(var0[n_emb:] + BN_EPS)
        c_c = params["stem_beta"] - a_c * mean0[n_emb:]
        a_stem = a_stem.at[n_emb:].set(a_c)
        c_stem = c_stem.at[n_emb:].set(c_c)
    mean_cur = a_stem * mean0 + c_stem          # exact stats of the stem output
    var_cur = a_stem * a_stem * var0
    pre_a, pre_c = a_stem, c_stem

    x = x_pad.astype(jnp.bfloat16)              # bf16 activation stream

    for i, (g, b, w, bias) in enumerate(blocks):
        ni, no = int(w.shape[0]), int(w.shape[1])
        ni_pad, no_pad = dims_pad[i], dims_pad[i + 1]
        is_last = i == n_blocks - 1

        # Fold this block's BN (and, for block 0, the stem BN) into the Linear.
        # NOTE: variance via E[y^2]-E[y]^2 in f32; post-BN activations are O(1)
        # so cancellation is benign, and the clamp guards the rsqrt.
        a_bn = g * jax.lax.rsqrt(var_cur + BN_EPS)
        c_bn = b - a_bn * mean_cur
        a = a_bn * pre_a
        c = a_bn * pre_c + c_bn
        w_folded = a[:, None] * w
        bias_folded = c @ w + bias

        w_p = jnp.pad(w_folded, ((0, ni_pad - ni), (0, no_pad - no))).astype(jnp.bfloat16)
        b_p = jnp.pad(bias_folded, (0, no_pad - no)).reshape(1, no_pad)

        need = _tiled_vmem_need(tile_b, ni_pad, no_pad)
        vmem_limit = min(cap - cap // 8, max(need + (8 << 20), 32 << 20))

        x, s, sq = _linear_block_tiled(
            x, w_p, b_p,
            apply_relu=not is_last, emit_stats=not is_last,
            tile_b=tile_b, b_true=B, n_cores=n_cores, vmem_limit=vmem_limit)

        if not is_last:
            mean_cur = s[:no] / B
            var_cur = jnp.maximum(sq[:no] / B - mean_cur * mean_cur, 0.0)
            pre_a = jnp.ones((no,), jnp.float32)
            pre_c = jnp.zeros((no,), jnp.float32)

    return x[:B, :n_out].astype(jnp.float32)


# ----------------------------------------------------------------------------
# Pure-JAX f32 reference mirroring the PyTorch module (training mode).
# ----------------------------------------------------------------------------
def _reference_forward(x_cat, x_cont, params):
    emb_ws = params["emb_ws"]
    embs = [jnp.take(w, x_cat[:, i], axis=0) for i, w in enumerate(emb_ws)]
    x_cont = x_cont.astype(jnp.float32)

    def bn(x, gamma, beta):
        mean = jnp.mean(x, axis=0, keepdims=True)
        var = jnp.mean(jnp.square(x - mean), axis=0, keepdims=True)
        return (x - mean) * jax.lax.rsqrt(var + BN_EPS) * gamma + beta

    if x_cont.shape[1]:
        x_cont = bn(x_cont, params["stem_gamma"], params["stem_beta"])
    x = jnp.concatenate(embs + [x_cont], axis=1) if embs else x_cont

    blocks = params["blocks"]
    for i, (g, b, w, bias) in enumerate(blocks):
        x = bn(x, g, b)
        x = x @ w + bias
        if i < len(blocks) - 1:
            x = jnp.maximum(x, 0.0)
    return x


def init_params(key, emb_sz, n_cont, layers, n_out):
    """Deterministic parameter initialization mirroring the module's shapes."""
    keys = jax.random.split(key, 2 * len(emb_sz) + 4 * (len(layers) + 1) + 1)
    kidx = 0

    emb_ws = []
    for (ni, nf) in emb_sz:
        emb_ws.append(0.01 * jax.random.normal(keys[kidx], (ni, nf), jnp.float32))
        kidx += 1

    stem_gamma = jnp.ones((n_cont,), jnp.float32)
    stem_beta = jnp.zeros((n_cont,), jnp.float32)

    dims = [sum(nf for _, nf in emb_sz) + n_cont] + list(layers) + [n_out]
    blocks = []
    for ni, no in zip(dims[:-1], dims[1:]):
        bound = 1.0 / math.sqrt(ni)
        w = jax.random.uniform(keys[kidx], (ni, no), jnp.float32, -bound, bound)
        kidx += 1
        bias = jax.random.uniform(keys[kidx], (no,), jnp.float32, -bound, bound)
        kidx += 1
        bn_gamma = jnp.ones((ni,), jnp.float32)
        bn_beta = jnp.zeros((ni,), jnp.float32)
        blocks.append((bn_gamma, bn_beta, w, bias))

    return {
        "emb_ws": emb_ws,
        "stem_gamma": stem_gamma,
        "stem_beta": stem_beta,
        "blocks": blocks,
    }


if __name__ == "__main__":
    key = jax.random.PRNGKey(0)

    # ---- Config 1: small, exercises the fused single-kernel (VMEM-resident) path
    #   emb_sz = [(10, 4), (7, 3)], n_cont = 5 -> input dim = 12; layers [32,16]; n_out 2
    B = 8
    emb_sz = [(10, 4), (7, 3)]
    n_cont = 5
    layers = [32, 16]
    n_out = 2

    k_par, k_cat0, k_cat1, k_cont, k2 = jax.random.split(key, 5)
    params = init_params(k_par, emb_sz, n_cont, layers, n_out)
    x_cat = jnp.stack(
        [
            jax.random.randint(k_cat0, (B,), 0, emb_sz[0][0], dtype=jnp.int32),
            jax.random.randint(k_cat1, (B,), 0, emb_sz[1][0], dtype=jnp.int32),
        ],
        axis=1,
    )
    x_cont = jax.random.normal(k_cont, (B, n_cont), jnp.float32)

    out = jax.jit(tabular_forward)(x_cat, x_cont, params)
    out = jax.block_until_ready(out)
    assert out.shape == (B, n_out)
    ref = _reference_forward(x_cat, x_cont, params)
    err = float(jnp.max(jnp.abs(out - ref)))
    # bf16 MXU inputs with f32 accumulation -> loose tolerance.
    assert err < 1e-1, f"fused path max abs error {err}"

    # ---- Config 2: larger ragged batch, forces the tiled/pipelined bf16-stream path
    B2 = 1000
    emb_sz2 = [(20, 6)]
    n_cont2 = 3
    layers2 = [64, 32]
    n_out2 = 3

    k_par2, k_cat2, k_cont2 = jax.random.split(k2, 3)
    params2 = init_params(k_par2, emb_sz2, n_cont2, layers2, n_out2)
    x_cat2 = jax.random.randint(k_cat2, (B2, 1), 0, emb_sz2[0][0], dtype=jnp.int32)
    x_cont2 = jax.random.normal(k_cont2, (B2, n_cont2), jnp.float32)

    fwd_tiled = jax.jit(partial(tabular_forward, force_tiled=True))
    out2 = jax.block_until_ready(fwd_tiled(x_cat2, x_cont2, params2))
    assert out2.shape == (B2, n_out2)
    ref2 = _reference_forward(x_cat2, x_cont2, params2)
    err2 = float(jnp.max(jnp.abs(out2 - ref2)))
    # bf16 activation stream + bf16 folded weights across 3 layers -> slightly looser.
    assert err2 < 2e-1, f"tiled path max abs error {err2}"

    print("KERNEL_OK")
</pallas_src>

<mosaic_0001>
module attributes {stable_mosaic.version = 11 : i64} {
  func.func @kernel(%arg0: i32, %arg1: memref<16x128xbf16, #tpu.memory_space<vmem>>, %arg2: memref<1x128xf32, #tpu.memory_space<vmem>>, %arg3: memref<1x128xf32, #tpu.memory_space<vmem>>, %arg4: memref<1x128xf32, #tpu.memory_space<vmem>>, %arg5: memref<1x128xf32, #tpu.memory_space<vmem>>, %arg6: memref<128x128xbf16, #tpu.memory_space<vmem>>, %arg7: memref<1x128xf32, #tpu.memory_space<vmem>>, %arg8: memref<1x128xf32, #tpu.memory_space<vmem>>, %arg9: memref<1x128xf32, #tpu.memory_space<vmem>>, %arg10: memref<128x128xbf16, #tpu.memory_space<vmem>>, %arg11: memref<1x128xf32, #tpu.memory_space<vmem>>, %arg12: memref<1x128xf32, #tpu.memory_space<vmem>>, %arg13: memref<1x128xf32, #tpu.memory_space<vmem>>, %arg14: memref<128x128xbf16, #tpu.memory_space<vmem>>, %arg15: memref<1x128xf32, #tpu.memory_space<vmem>>, %arg16: memref<16x128xf32, #tpu.memory_space<vmem>>) attributes {dimension_semantics = [#tpu.dimension_semantics<arbitrary>], iteration_bounds = array<i64: 1>, scalar_prefetch = 0 : i64, scratch_operands = 0 : i64, tpu.core_type = #tpu.core_type<tc>, window_params = [{pipeline_mode = #tpu.pipeline_mode<synchronous>, transform_indices = @transform_0, window_bounds = array<i64: 16, 128>}, {pipeline_mode = #tpu.pipeline_mode<synchronous>, transform_indices = @transform_1, window_bounds = array<i64: 1, 128>}, {pipeline_mode = #tpu.pipeline_mode<synchronous>, transform_indices = @transform_2, window_bounds = array<i64: 1, 128>}, {pipeline_mode = #tpu.pipeline_mode<synchronous>, transform_indices = @transform_3, window_bounds = array<i64: 1, 128>}, {pipeline_mode = #tpu.pipeline_mode<synchronous>, transform_indices = @transform_4, window_bounds = array<i64: 1, 128>}, {pipeline_mode = #tpu.pipeline_mode<synchronous>, transform_indices = @transform_5, window_bounds = array<i64: 128, 128>}, {pipeline_mode = #tpu.pipeline_mode<synchronous>, transform_indices = @transform_6, window_bounds = array<i64: 1, 128>}, {pipeline_mode = #tpu.pipeline_mode<synchronous>, transform_indices = @transform_7, window_bounds = array<i64: 1, 128>}, {pipeline_mode = #tpu.pipeline_mode<synchronous>, transform_indices = @transform_8, window_bounds = array<i64: 1, 128>}, {pipeline_mode = #tpu.pipeline_mode<synchronous>, transform_indices = @transform_9, window_bounds = array<i64: 128, 128>}, {pipeline_mode = #tpu.pipeline_mode<synchronous>, transform_indices = @transform_10, window_bounds = array<i64: 1, 128>}, {pipeline_mode = #tpu.pipeline_mode<synchronous>, transform_indices = @transform_11, window_bounds = array<i64: 1, 128>}, {pipeline_mode = #tpu.pipeline_mode<synchronous>, transform_indices = @transform_12, window_bounds = array<i64: 1, 128>}, {pipeline_mode = #tpu.pipeline_mode<synchronous>, transform_indices = @transform_13, window_bounds = array<i64: 128, 128>}, {pipeline_mode = #tpu.pipeline_mode<synchronous>, transform_indices = @transform_14, window_bounds = array<i64: 1, 128>}, {pipeline_mode = #tpu.pipeline_mode<synchronous>, transform_indices = @transform_15, window_bounds = array<i64: 16, 128>}]} {
    %0 = tpu.iota {dimensions = array<i32: 0>} : vector<16x1xi32>
    %c8_i32 = arith.constant 8 : i32
    %1 = vector.broadcast %c8_i32 : i32 to vector<16x1xi32>
    %2 = arith.cmpi slt, %0, %1 : vector<16x1xi32>
    %c0 = arith.constant 0 : index
    %c0_0 = arith.constant 0 : index
    %3 = vector.load %arg1[%c0, %c0_0] : memref<16x128xbf16, #tpu.memory_space<vmem>>, vector<16x128xbf16>
    %4 = arith.extf %3 : vector<16x128xbf16> to vector<16x128xf32>
    %cst = arith.constant dense<0.000000e+00> : vector<128xf32>
    %5 = vector.multi_reduction <add>, %4, %cst [0] : vector<16x128xf32> to vector<128xf32>
    %6 = vector.shape_cast %5 : vector<128xf32> to vector<1x128xf32>
    %cst_1 = arith.constant 1.250000e-01 : f32
    %7 = vector.broadcast %cst_1 : f32 to vector<1x128xf32>
    %8 = arith.mulf %6, %7 : vector<1x128xf32>
    %9 = arith.mulf %4, %4 : vector<16x128xf32>
    %cst_2 = arith.constant dense<0.000000e+00> : vector<128xf32>
    %10 = vector.multi_reduction <add>, %9, %cst_2 [0] : vector<16x128xf32> to vector<128xf32>
    %11 = vector.shape_cast %10 : vector<128xf32> to vector<1x128xf32>
    %cst_3 = arith.constant 1.250000e-01 : f32
    %12 = vector.broadcast %cst_3 : f32 to vector<1x128xf32>
    %13 = arith.mulf %11, %12 : vector<1x128xf32>
    %14 = arith.mulf %8, %8 : vector<1x128xf32>
    %15 = arith.subf %13, %14 : vector<1x128xf32>
    %cst_4 = arith.constant 0.000000e+00 : f32
    %16 = vector.broadcast %cst_4 : f32 to vector<1x128xf32>
    %17 = arith.maximumf %15, %16 : vector<1x128xf32>
    %18 = tpu.iota {dimensions = array<i32: 1>} : vector<1x128xi32>
    %c7_i32 = arith.constant 7 : i32
    %19 = vector.broadcast %c7_i32 : i32 to vector<1x128xi32>
    %20 = arith.cmpi sge, %18, %19 : vector<1x128xi32>
    %c12_i32 = arith.constant 12 : i32
    %21 = vector.broadcast %c12_i32 : i32 to vector<1x128xi32>
    %22 = arith.cmpi slt, %18, %21 : vector<1x128xi32>
    %23 = arith.andi %20, %22 : vector<1x128xi1>
    %c0_5 = arith.constant 0 : index
    %c0_6 = arith.constant 0 : index
    %24 = vector.load %arg2[%c0_5, %c0_6] : memref<1x128xf32, #tpu.memory_space<vmem>>, vector<1x128xf32>
    %cst_7 = arith.constant 9.99999974E-6 : f32
    %25 = vector.broadcast %cst_7 : f32 to vector<1x128xf32>
    %26 = arith.addf %17, %25 : vector<1x128xf32>
    %27 = math.rsqrt %26 : vector<1x128xf32>
    %28 = arith.mulf %24, %27 : vector<1x128xf32>
    %cst_8 = arith.constant 1.000000e+00 : f32
    %29 = vector.broadcast %cst_8 : f32 to vector<1x128xf32>
    %30 = arith.select %23, %28, %29 : vector<1x128xi1>, vector<1x128xf32>
    %c0_9 = arith.constant 0 : index
    %c0_10 = arith.constant 0 : index
    %31 = vector.load %arg3[%c0_9, %c0_10] : memref<1x128xf32, #tpu.memory_space<vmem>>, vector<1x128xf32>
    %32 = arith.mulf %30, %8 : vector<1x128xf32>
    %33 = arith.subf %31, %32 : vector<1x128xf32>
    %cst_11 = arith.constant 0.000000e+00 : f32
    %34 = vector.broadcast %cst_11 : f32 to vector<1x128xf32>
    %35 = arith.select %23, %33, %34 : vector<1x128xi1>, vector<1x128xf32>
    %36 = arith.mulf %30, %8 : vector<1x128xf32>
    %37 = arith.addf %36, %35 : vector<1x128xf32>
    %38 = arith.mulf %30, %30 : vector<1x128xf32>
    %39 = arith.mulf %38, %17 : vector<1x128xf32>
    %c0_12 = arith.constant 0 : index
    %c0_13 = arith.constant 0 : index
    %40 = vector.load %arg4[%c0_12, %c0_13] : memref<1x128xf32, #tpu.memory_space<vmem>>, vector<1x128xf32>
    %cst_14 = arith.constant 9.99999974E-6 : f32
    %41 = vector.broadcast %cst_14 : f32 to vector<1x128xf32>
    %42 = arith.addf %39, %41 : vector<1x128xf32>
    %43 = math.rsqrt %42 : vector<1x128xf32>
    %44 = arith.mulf %40, %43 : vector<1x128xf32>
    %c0_15 = arith.constant 0 : index
    %c0_16 = arith.constant 0 : index
    %45 = vector.load %arg5[%c0_15, %c0_16] : memref<1x128xf32, #tpu.memory_space<vmem>>, vector<1x128xf32>
    %46 = arith.mulf %44, %37 : vector<1x128xf32>
    %47 = arith.subf %45, %46 : vector<1x128xf32>
    %48 = arith.mulf %44, %30 : vector<1x128xf32>
    %49 = arith.mulf %44, %35 : vector<1x128xf32>
    %50 = arith.addf %49, %47 : vector<1x128xf32>
    %51 = vector.broadcast %48 : vector<1x128xf32> to vector<16x128xf32>
    %52 = arith.mulf %4, %51 : vector<16x128xf32>
    %53 = vector.broadcast %50 : vector<1x128xf32> to vector<16x128xf32>
    %54 = arith.addf %52, %53 : vector<16x128xf32>
    %55 = arith.truncf %54 : vector<16x128xf32> to vector<16x128xbf16>
    %c0_17 = arith.constant 0 : index
    %c0_18 = arith.constant 0 : index
    %56 = vector.load %arg6[%c0_17, %c0_18] : memref<128x128xbf16, #tpu.memory_space<vmem>>, vector<128x128xbf16>
    %cst_19 = arith.constant dense<0.000000e+00> : vector<16x128xf32>
    %57 = tpu.matmul %55, %56, %cst_19 {dimension_numbers = #tpu.dot_dimension_numbers<[1], [0], [0], [1], [0, 0, 1, 1], [], []>} : vector<16x128xbf16>, vector<128x128xbf16>, vector<16x128xf32> -> vector<16x128xf32>
    %c0_20 = arith.constant 0 : index
    %c0_21 = arith.constant 0 : index
    %58 = vector.load %arg7[%c0_20, %c0_21] : memref<1x128xf32, #tpu.memory_space<vmem>>, vector<1x128xf32>
    %59 = vector.broadcast %58 : vector<1x128xf32> to vector<16x128xf32>
    %60 = arith.addf %57, %59 : vector<16x128xf32>
    %cst_22 = arith.constant 0.000000e+00 : f32
    %61 = vector.broadcast %cst_22 : f32 to vector<16x128xf32>
    %62 = arith.maximumf %60, %61 : vector<16x128xf32>
    %cst_23 = arith.constant 0.000000e+00 : f32
    %63 = vector.shape_cast %2 : vector<16x1xi1> to vector<16x1xi1>
    %64 = vector.broadcast %63 : vector<16x1xi1> to vector<16x128xi1>
    %65 = vector.broadcast %cst_23 : f32 to vector<16x128xf32>
    %66 = arith.select %64, %62, %65 : vector<16x128xi1>, vector<16x128xf32>
    %cst_24 = arith.constant dense<0.000000e+00> : vector<128xf32>
    %67 = vector.multi_reduction <add>, %66, %cst_24 [0] : vector<16x128xf32> to vector<128xf32>
    %68 = vector.shape_cast %67 : vector<128xf32> to vector<1x128xf32>
    %cst_25 = arith.constant 1.250000e-01 : f32
    %69 = vector.broadcast %cst_25 : f32 to vector<1x128xf32>
    %70 = arith.mulf %68, %69 : vector<1x128xf32>
    %71 = arith.mulf %66, %66 : vector<16x128xf32>
    %cst_26 = arith.constant dense<0.000000e+00> : vector<128xf32>
    %72 = vector.multi_reduction <add>, %71, %cst_26 [0] : vector<16x128xf32> to vector<128xf32>
    %73 = vector.shape_cast %72 : vector<128xf32> to vector<1x128xf32>
    %cst_27 = arith.constant 1.250000e-01 : f32
    %74 = vector.broadcast %cst_27 : f32 to vector<1x128xf32>
    %75 = arith.mulf %73, %74 : vector<1x128xf32>
    %76 = arith.mulf %70, %70 : vector<1x128xf32>
    %77 = arith.subf %75, %76 : vector<1x128xf32>
    %cst_28 = arith.constant 0.000000e+00 : f32
    %78 = vector.broadcast %cst_28 : f32 to vector<1x128xf32>
    %79 = arith.maximumf %77, %78 : vector<1x128xf32>
    %cst_29 = arith.constant 1.000000e+00 : f32
    %80 = vector.broadcast %cst_29 : f32 to vector<1x128xf32>
    %cst_30 = arith.constant 0.000000e+00 : f32
    %81 = vector.broadcast %cst_30 : f32 to vector<1x128xf32>
    %c0_31 = arith.constant 0 : index
    %c0_32 = arith.constant 0 : index
    %82 = vector.load %arg8[%c0_31, %c0_32] : memref<1x128xf32, #tpu.memory_space<vmem>>, vector<1x128xf32>
    %cst_33 = arith.constant 9.99999974E-6 : f32
    %83 = vector.broadcast %cst_33 : f32 to vector<1x128xf32>
    %84 = arith.addf %79, %83 : vector<1x128xf32>
    %85 = math.rsqrt %84 : vector<1x128xf32>
    %86 = arith.mulf %82, %85 : vector<1x128xf32>
    %c0_34 = arith.constant 0 : index
    %c0_35 = arith.constant 0 : index
    %87 = vector.load %arg9[%c0_34, %c0_35] : memref<1x128xf32, #tpu.memory_space<vmem>>, vector<1x128xf32>
    %88 = arith.mulf %86, %70 : vector<1x128xf32>
    %89 = arith.subf %87, %88 : vector<1x128xf32>
    %90 = arith.mulf %86, %80 : vector<1x128xf32>
    %91 = arith.mulf %86, %81 : vector<1x128xf32>
    %92 = arith.addf %91, %89 : vector<1x128xf32>
    %93 = vector.broadcast %90 : vector<1x128xf32> to vector<16x128xf32>
    %94 = arith.mulf %66, %93 : vector<16x128xf32>
    %95 = vector.broadcast %92 : vector<1x128xf32> to vector<16x128xf32>
    %96 = arith.addf %94, %95 : vector<16x128xf32>
    %97 = arith.truncf %96 : vector<16x128xf32> to vector<16x128xbf16>
    %c0_36 = arith.constant 0 : index
    %c0_37 = arith.constant 0 : index
    %98 = vector.load %arg10[%c0_36, %c0_37] : memref<128x128xbf16, #tpu.memory_space<vmem>>, vector<128x128xbf16>
    %cst_38 = arith.constant dense<0.000000e+00> : vector<16x128xf32>
    %99 = tpu.matmul %97, %98, %cst_38 {dimension_numbers = #tpu.dot_dimension_numbers<[1], [0], [0], [1], [0, 0, 1, 1], [], []>} : vector<16x128xbf16>, vector<128x128xbf16>, vector<16x128xf32> -> vector<16x128xf32>
    %c0_39 = arith.constant 0 : index
    %c0_40 = arith.constant 0 : index
    %100 = vector.load %arg11[%c0_39, %c0_40] : memref<1x128xf32, #tpu.memory_space<vmem>>, vector<1x128xf32>
    %101 = vector.broadcast %100 : vector<1x128xf32> to vector<16x128xf32>
    %102 = arith.addf %99, %101 : vector<16x128xf32>
    %cst_41 = arith.constant 0.000000e+00 : f32
    %103 = vector.broadcast %cst_41 : f32 to vector<16x128xf32>
    %104 = arith.maximumf %102, %103 : vector<16x128xf32>
    %cst_42 = arith.constant 0.000000e+00 : f32
    %105 = vector.shape_cast %2 : vector<16x1xi1> to vector<16x1xi1>
    %106 = vector.broadcast %105 : vector<16x1xi1> to vector<16x128xi1>
    %107 = vector.broadcast %cst_42 : f32 to vector<16x128xf32>
    %108 = arith.select %106, %104, %107 : vector<16x128xi1>, vector<16x128xf32>
    %cst_43 = arith.constant dense<0.000000e+00> : vector<128xf32>
    %109 = vector.multi_reduction <add>, %108, %cst_43 [0] : vector<16x128xf32> to vector<128xf32>
    %110 = vector.shape_cast %109 : vector<128xf32> to vector<1x128xf32>
    %cst_44 = arith.constant 1.250000e-01 : f32
    %111 = vector.broadcast %cst_44 : f32 to vector<1x128xf32>
    %112 = arith.mulf %110, %111 : vector<1x128xf32>
    %113 = arith.mulf %108, %108 : vector<16x128xf32>
    %cst_45 = arith.constant dense<0.000000e+00> : vector<128xf32>
    %114 = vector.multi_reduction <add>, %113, %cst_45 [0] : vector<16x128xf32> to vector<128xf32>
    %115 = vector.shape_cast %114 : vector<128xf32> to vector<1x128xf32>
    %cst_46 = arith.constant 1.250000e-01 : f32
    %116 = vector.broadcast %cst_46 : f32 to vector<1x128xf32>
    %117 = arith.mulf %115, %116 : vector<1x128xf32>
    %118 = arith.mulf %112, %112 : vector<1x128xf32>
    %119 = arith.subf %117, %118 : vector<1x128xf32>
    %cst_47 = arith.constant 0.000000e+00 : f32
    %120 = vector.broadcast %cst_47 : f32 to vector<1x128xf32>
    %121 = arith.maximumf %119, %120 : vector<1x128xf32>
    %cst_48 = arith.constant 1.000000e+00 : f32
    %122 = vector.broadcast %cst_48 : f32 to vector<1x128xf32>
    %cst_49 = arith.constant 0.000000e+00 : f32
    %123 = vector.broadcast %cst_49 : f32 to vector<1x128xf32>
    %c0_50 = arith.constant 0 : index
    %c0_51 = arith.constant 0 : index
    %124 = vector.load %arg12[%c0_50, %c0_51] : memref<1x128xf32, #tpu.memory_space<vmem>>, vector<1x128xf32>
    %cst_52 = arith.constant 9.99999974E-6 : f32
    %125 = vector.broadcast %cst_52 : f32 to vector<1x128xf32>
    %126 = arith.addf %121, %125 : vector<1x128xf32>
    %127 = math.rsqrt %126 : vector<1x128xf32>
    %128 = arith.mulf %124, %127 : vector<1x128xf32>
    %c0_53 = arith.constant 0 : index
    %c0_54 = arith.constant 0 : index
    %129 = vector.load %arg13[%c0_53, %c0_54] : memref<1x128xf32, #tpu.memory_space<vmem>>, vector<1x128xf32>
    %130 = arith.mulf %128, %112 : vector<1x128xf32>
    %131 = arith.subf %129, %130 : vector<1x128xf32>
    %132 = arith.mulf %128, %122 : vector<1x128xf32>
    %133 = arith.mulf %128, %123 : vector<1x128xf32>
    %134 = arith.addf %133, %131 : vector<1x128xf32>
    %135 = vector.broadcast %132 : vector<1x128xf32> to vector<16x128xf32>
    %136 = arith.mulf %108, %135 : vector<16x128xf32>
    %137 = vector.broadcast %134 : vector<1x128xf32> to vector<16x128xf32>
    %138 = arith.addf %136, %137 : vector<16x128xf32>
    %139 = arith.truncf %138 : vector<16x128xf32> to vector<16x128xbf16>
    %c0_55 = arith.constant 0 : index
    %c0_56 = arith.constant 0 : index
    %140 = vector.load %arg14[%c0_55, %c0_56] : memref<128x128xbf16, #tpu.memory_space<vmem>>, vector<128x128xbf16>
    %cst_57 = arith.constant dense<0.000000e+00> : vector<16x128xf32>
    %141 = tpu.matmul %139, %140, %cst_57 {dimension_numbers = #tpu.dot_dimension_numbers<[1], [0], [0], [1], [0, 0, 1, 1], [], []>} : vector<16x128xbf16>, vector<128x128xbf16>, vector<16x128xf32> -> vector<16x128xf32>
    %c0_58 = arith.constant 0 : index
    %c0_59 = arith.constant 0 : index
    %142 = vector.load %arg15[%c0_58, %c0_59] : memref<1x128xf32, #tpu.memory_space<vmem>>, vector<1x128xf32>
    %143 = vector.broadcast %142 : vector<1x128xf32> to vector<16x128xf32>
    %144 = arith.addf %141, %143 : vector<16x128xf32>
    %c0_60 = arith.constant 0 : index
    %c0_61 = arith.constant 0 : index
    %145 = vector.load %arg16[%c0_60, %c0_61] : memref<16x128xf32, #tpu.memory_space<vmem>>, vector<16x128xf32>
    tpu.vector_store %arg16[%c0_60, %c0_61], %144 {strides = array<i32>} : memref<16x128xf32, #tpu.memory_space<vmem>>, vector<16x128xf32>,
    return
  }
  func.func @transform_0(%arg0: i32) -> (i32, i32) {
    %c0_i32 = arith.constant 0 : i32
    %c0_i32_0 = arith.constant 0 : i32
    %c0_i32_1 = arith.constant 0 : i32
    return %c0_i32, %c0_i32_0 : i32, i32
  }
  func.func @transform_1(%arg0: i32) -> (i32, i32) {
    %c0_i32 = arith.constant 0 : i32
    %c0_i32_0 = arith.constant 0 : i32
    %c0_i32_1 = arith.constant 0 : i32
    return %c0_i32, %c0_i32_0 : i32, i32
  }
  func.func @transform_2(%arg0: i32) -> (i32, i32) {
    %c0_i32 = arith.constant 0 : i32
    %c0_i32_0 = arith.constant 0 : i32
    %c0_i32_1 = arith.constant 0 : i32
    return %c0_i32, %c0_i32_0 : i32, i32
  }
  func.func @transform_3(%arg0: i32) -> (i32, i32) {
    %c0_i32 = arith.constant 0 : i32
    %c0_i32_0 = arith.constant 0 : i32
    %c0_i32_1 = arith.constant 0 : i32
    return %c0_i32, %c0_i32_0 : i32, i32
  }
  func.func @transform_4(%arg0: i32) -> (i32, i32) {
    %c0_i32 = arith.constant 0 : i32
    %c0_i32_0 = arith.constant 0 : i32
    %c0_i32_1 = arith.constant 0 : i32
    return %c0_i32, %c0_i32_0 : i32, i32
  }
  func.func @transform_5(%arg0: i32) -> (i32, i32) {
    %c0_i32 = arith.constant 0 : i32
    %c0_i32_0 = arith.constant 0 : i32
    %c0_i32_1 = arith.constant 0 : i32
    return %c0_i32, %c0_i32_0 : i32, i32
  }
  func.func @transform_6(%arg0: i32) -> (i32, i32) {
    %c0_i32 = arith.constant 0 : i32
    %c0_i32_0 = arith.constant 0 : i32
    %c0_i32_1 = arith.constant 0 : i32
    return %c0_i32, %c0_i32_0 : i32, i32
  }
  func.func @transform_7(%arg0: i32) -> (i32, i32) {
    %c0_i32 = arith.constant 0 : i32
    %c0_i32_0 = arith.constant 0 : i32
    %c0_i32_1 = arith.constant 0 : i32
    return %c0_i32, %c0_i32_0 : i32, i32
  }
  func.func @transform_8(%arg0: i32) -> (i32, i32) {
    %c0_i32 = arith.constant 0 : i32
    %c0_i32_0 = arith.constant 0 : i32
    %c0_i32_1 = arith.constant 0 : i32
    return %c0_i32, %c0_i32_0 : i32, i32
  }
  func.func @transform_9(%arg0: i32) -> (i32, i32) {
    %c0_i32 = arith.constant 0 : i32
    %c0_i32_0 = arith.constant 0 : i32
    %c0_i32_1 = arith.constant 0 : i32
    return %c0_i32, %c0_i32_0 : i32, i32
  }
  func.func @transform_10(%arg0: i32) -> (i32, i32) {
    %c0_i32 = arith.constant 0 : i32
    %c0_i32_0 = arith.constant 0 : i32
    %c0_i32_1 = arith.constant 0 : i32
    return %c0_i32, %c0_i32_0 : i32, i32
  }
  func.func @transform_11(%arg0: i32) -> (i32, i32) {
    %c0_i32 = arith.constant 0 : i32
    %c0_i32_0 = arith.constant 0 : i32
    %c0_i32_1 = arith.constant 0 : i32
    return %c0_i32, %c0_i32_0 : i32, i32
  }
  func.func @transform_12(%arg0: i32) -> (i32, i32) {
    %c0_i32 = arith.constant 0 : i32
    %c0_i32_0 = arith.constant 0 : i32
    %c0_i32_1 = arith.constant 0 : i32
    return %c0_i32, %c0_i32_0 : i32, i32
  }
  func.func @transform_13(%arg0: i32) -> (i32, i32) {
    %c0_i32 = arith.constant 0 : i32
    %c0_i32_0 = arith.constant 0 : i32
    %c0_i32_1 = arith.constant 0 : i32
    return %c0_i32, %c0_i32_0 : i32, i32
  }
  func.func @transform_14(%arg0: i32) -> (i32, i32) {
    %c0_i32 = arith.constant 0 : i32
    %c0_i32_0 = arith.constant 0 : i32
    %c0_i32_1 = arith.constant 0 : i32
    return %c0_i32, %c0_i32_0 : i32, i32
  }
  func.func @transform_15(%arg0: i32) -> (i32, i32) {
    %c0_i32 = arith.constant 0 : i32
    %c0_i32_0 = arith.constant 0 : i32
    %c0_i32_1 = arith.constant 0 : i32
    return %c0_i32, %c0_i32_0 : i32, i32
  }
}

</mosaic_0001>

<bundles_post_ra>
// kernel: tabular_forward.1
= control target key start
LH: loop header
LB: loop body
LE: loop exit
PB: predicated region body
PF: predicated region fallthrough
CT: control target
= control target key end

     0   :  { %v725_v0 = vmov 0.0   ;;  %vm726_vm0 = vmmov 0   ;;  %v81_v34 = vlaneseq  ;;  %s971_s5 = inlined_call_operand.vmem [shape: bf16[128,128], index: 5, kind: input, shape index: {}]   ;;  %s972_s0 = inlined_call_operand.vmem [shape: bf16[16,128], index: 0, kind: input, shape index: {}]   ;;  %s973_s1 = inlined_call_operand.vmem [shape: f32[1,128], index: 1, kind: input, shape index: {}]   ;;  %s974_s2 = inlined_call_operand.vmem [shape: f32[1,128], index: 2, kind: input, shape index: {}]   ;;  %s975_s3 = inlined_call_operand.vmem [shape: f32[1,128], index: 3, kind: input, shape index: {}]   ;;  %s976_s4 = inlined_call_operand.vmem [shape: f32[1,128], index: 4, kind: input, shape index: {}]   ;;  %s977_s9 = inlined_call_operand.vmem [shape: bf16[128,128], index: 9, kind: input, shape index: {}]   ;;  %s978_s6 = inlined_call_operand.vmem [shape: f32[1,128], index: 6, kind: input, shape index: {}]   ;;  %s979_s7 = inlined_call_operand.vmem [shape: f32[1,128], index: 7, kind: input, shape index: {}]   ;;  %s980_s8 = inlined_call_operand.vmem [shape: f32[1,128], index: 8, kind: input, shape index: {}]   ;;  %s981_s13 = inlined_call_operand.vmem [shape: bf16[128,128], index: 13, kind: input, shape index: {}]   ;;  %s982_s10 = inlined_call_operand.vmem [shape: f32[1,128], index: 10, kind: input, shape index: {}]   ;;  %s983_s11 = inlined_call_operand.vmem [shape: f32[1,128], index: 11, kind: input, shape index: {}]   ;;  %s984_s12 = inlined_call_operand.vmem [shape: f32[1,128], index: 12, kind: input, shape index: {}]   ;;  %s985_s14 = inlined_call_operand.vmem [shape: f32[1,128], index: 14, kind: input, shape index: {}]   ;;  %s986_s15 = inlined_call_operand.vmem [shape: f32[16,128], index: 15, kind: output, shape index: {}]  }
   0x1   :  { %631 = vmatprep.subr.bf16.mxu0 %v725_v0  ;;  %v693_v1 = vld [vmem:[%s971_s5] sm:$0xff]   ;;  %647 = vmatprep.mubr.msk.bf16.mxu0 %vm726_vm0, %v725_v0  ;;  %v694_v2 = vld [vmem:[%s971_s5 + $0x8] sm:$0xff]   ;;  %v695_v3 = vld [vmem:[%s971_s5 + $0x10] sm:$0xff]  }
   0x2   :  { %651 = vmatprep.subr.bf16.mxu1 %v725_v0  ;;  %667 = vmatprep.mubr.msk.bf16.mxu1 %vm726_vm0, %v725_v0  ;;  %v601_v4 = vld [vmem:[%s972_s0] sm:$0xff]   ;;  %v696_v7 = vld [vmem:[%s971_s5 + $0x18] sm:$0xff]   ;;  %v698_v18 = vld [vmem:[%s971_s5 + $0x28] sm:$0xff]   ;;  %v82_v35 = vand.u32 127, %v81_v34  ;;  %v110_v47 = vshrl.u32 %v81_v34, 7 }
   0x3   :  { %632 = vmatpush3.bf16.msra.mxu0 %v693_v1  ;;  %v827_v5 = vunpack.c.l.bf16 %v601_v4  ;;  %v829_v6 = vunpack.c.h.bf16 %v601_v4  ;;  %v697_v13 = vld [vmem:[%s971_s5 + $0x20] sm:$0xff]   ;;  %v699_v23 = vld [vmem:[%s971_s5 + $0x30] sm:$0xff]   ;;  %v700_v28 = vld [vmem:[%s971_s5 + $0x38] sm:$0xff]  }
   0x4   :  { %633 = vmatprep.subr.bf16.mxu0 %v725_v0  ;;  %vm83_vm1 = vcmp.ge.s32.totalorder %v82_v35, 7  ;;  %vm84_vm2 = vcmp.lt.s32.totalorder %v82_v35, 12  ;;  %v86_v36 = vld [vmem:[%s973_s1] sm:$0x1]  ;;  %v867_v52 = vsub.s32 0, %v110_v47  ;;  %v702_v4 = vld [vmem:[%s977_s9 + $0x8] sm:$0xff]  }
   0x5   :  { %v60_v8 = vadd.f32 %v829_v6, %v827_v5  ;;  %v68_v9 = vmul.f32 %v827_v5, %v827_v5  ;;  %v69_v10 = vmul.f32 %v829_v6, %v829_v6  ;;  %vm85_vm3 = vmand %vm83_vm1, %vm84_vm2  ;;  %v91_v44 = vld [vmem:[%s974_s2] sm:$0x1] }
   0x6   :  { %v98_v48 = vld [vmem:[%s975_s3] sm:$0x1] }
   0x7   :  { %634 = vmatpush3.bf16.msra.mxu0 %v694_v2  ;;  %v61_v11 = vrot.slane %v60_v8, 4  ;;  %v70_v12 = vadd.f32 %v69_v10, %v68_v9  ;;  %v102_v53 = vld [vmem:[%s976_s4] sm:$0x1]  ;;  %v707_v9 = vld [vmem:[%s977_s9 + $0x30] sm:$0xff]   ;;  %v708_v10 = vld [vmem:[%s977_s9 + $0x38] sm:$0xff]  }
   0x8   :  { %635 = vmatprep.subr.bf16.mxu0 %v725_v0 }
   0x9   :  { %v62_v14 = vadd.f32 %v61_v11, %v60_v8  ;;  %v71_v15 = vrot.slane %v70_v12, 4  ;;  %v706_v8 = vld [vmem:[%s977_s9 + $0x28] sm:$0xff]   ;;  %v573_v11 = vld [vmem:[%s978_s6] ss:$0 sm:$0xff] }
   0xb   :  { %636 = vmatpush3.bf16.msra.mxu0 %v695_v3  ;;  %v63_v16 = vrot.slane %v62_v14, 2  ;;  %v72_v17 = vadd.f32 %v71_v15, %v70_v12  ;;  %v701_v3 = vld [vmem:[%s977_s9] sm:$0xff]  }
   0xc   :  { %637 = vmatprep.subr.bf16.mxu0 %v725_v0  ;;  %652 = vmatpush3.bf16.msra.mxu1 %v701_v3 }
   0xd   :  { %v64_v19 = vadd.f32 %v63_v16, %v62_v14  ;;  %v73_v20 = vrot.slane %v72_v17, 2  ;;  %653 = vmatprep.subr.bf16.mxu1 %v725_v0 }
   0xf   :  { %638 = vmatpush3.bf16.msra.mxu0 %v696_v7  ;;  %v65_v21 = vrot.slane %v64_v19, 1  ;;  %v74_v22 = vadd.f32 %v73_v20, %v72_v17  ;;  %v705_v7 = vld [vmem:[%s977_s9 + $0x20] sm:$0xff]  }
  0x10   :  { %639 = vmatprep.subr.bf16.mxu0 %v725_v0  ;;  %654 = vmatpush3.bf16.msra.mxu1 %v702_v4 }
  0x11   :  { %v66_v24 = vadd.f32 %v65_v21, %v64_v19  ;;  %v75_v25 = vrot.slane %v74_v22, 1  ;;  %655 = vmatprep.subr.bf16.mxu1 %v725_v0 }
  0x13   :  { %640 = vmatpush3.bf16.msra.mxu0 %v697_v13  ;;  %v67_v26 = vmul.f32 0.125, %v66_v24  ;;  %v76_v27 = vadd.f32 %v75_v25, %v74_v22 }
  0x14   :  { %641 = vmatprep.subr.bf16.mxu0 %v725_v0 }
  0x15   :  { %v77_v29 = vmul.f32 0.125, %v76_v27  ;;  %v78_v30 = vmul.f32 %v67_v26, %v67_v26 }
  0x17   :  { %642 = vmatpush3.bf16.msra.mxu0 %v698_v18  ;;  %v79_v31 = vsub.f32 %v77_v29, %v78_v30 }
  0x18   :  { %643 = vmatprep.subr.bf16.mxu0 %v725_v0 }
  0x19   :  { %v80_v32 = vmax.f32 %v79_v31, 0.0 }
  0x1b   :  { %644 = vmatpush3.bf16.msra.mxu0 %v699_v23  ;;  %v87_v33 = vadd.f32 1e-05, %v80_v32 }
  0x1c   :  { %645 = vmatprep.subr.bf16.mxu0 %v725_v0 }
  0x1d   :  { %717 = vrsqrt.f32 %v87_v33 }
  0x1f   :  { %646 = vmatpush3.bf16.msra.mxu0 %v700_v28 }
  0x20   :  { %671 = vmatprep.subr.bf16.mxu0 %v725_v0 }
  0x27   :  { %v718_v37 = vpop.eup %717 }
  0x28   :  { %v89_v38 = vmul.f32 %v718_v37, %v86_v36  ;;  %v266_v37 = vld [vmem:[%s979_s7] sm:$0x1] }
  0x2a   :  { %v90_v39 = vsel %vm85_vm3, %v89_v38, 1.0 }
  0x2b   :  { %v96_v40 = vmul.f32 %v90_v39, %v90_v39  ;;  %v92_v42 = vmul.f32 %v90_v39, %v67_v26 }
  0x2d   :  { %v97_v41 = vmul.f32 %v96_v40, %v80_v32  ;;  %v93_v45 = vsub.f32 %v91_v44, %v92_v42  ;;  %v270_v40 = vld [vmem:[%s980_s8] sm:$0x1] }
  0x2f   :  { %v99_v43 = vadd.f32 1e-05, %v97_v41  ;;  %v94_v46 = vsel %vm85_vm3, %v93_v45, 0.0 }
  0x30   :  { %v95_v49 = vadd.f32 %v94_v46, %v92_v42 }
  0x31   :  { %719 = vrsqrt.f32 %v99_v43 }
  0x3b   :  { %v720_v50 = vpop.eup %719 }
  0x3c   :  { %v101_v51 = vmul.f32 %v720_v50, %v98_v48 }
  0x3e   :  { %v103_v54 = vmul.f32 %v101_v51, %v95_v49  ;;  %v105_v55 = vmul.f32 %v101_v51, %v90_v39  ;;  %v106_v56 = vmul.f32 %v101_v51, %v94_v46 }
  0x40   :  { %v104_v57 = vsub.f32 %v102_v53, %v103_v54  ;;  %v112_v58 = vrot.slane %v105_v55, %v867_v52  ;;  %v709_v53 = vld [vmem:[%s981_s13] sm:$0xff]   ;;  %v710_v54 = vld [vmem:[%s981_s13 + $0x8] sm:$0xff]   ;;  %v711_v55 = vld [vmem:[%s981_s13 + $0x10] sm:$0xff]  }
  0x42   :  { %v107_v59 = vadd.f32 %v106_v56, %v104_v57  ;;  %v114_v60 = vmul.f32 %v827_v5, %v112_v58  ;;  %v115_v61 = vmul.f32 %v829_v6, %v112_v58  ;;  %v703_v5 = vld [vmem:[%s977_s9 + $0x10] sm:$0xff]   ;;  %v704_v6 = vld [vmem:[%s977_s9 + $0x18] sm:$0xff]   ;;  %v713_v57 = vld [vmem:[%s981_s13 + $0x20] sm:$0xff]  }
  0x43   :  { %656 = vmatpush3.bf16.msra.mxu1 %v703_v5  ;;  %v712_v56 = vld [vmem:[%s981_s13 + $0x18] sm:$0xff]   ;;  %v714_v58 = vld [vmem:[%s981_s13 + $0x28] sm:$0xff]  }
  0x44   :  { %v120_v62 = vrot.slane %v107_v59, %v867_v52  ;;  %657 = vmatprep.subr.bf16.mxu1 %v725_v0  ;;  %v715_v59 = vld [vmem:[%s981_s13 + $0x30] sm:$0xff]  }
  0x46   :  { %v122_v63 = vadd.f32 %v120_v62, %v114_v60  ;;  %v123_v1 = vadd.f32 %v120_v62, %v115_v61  ;;  %v716_v60 = vld [vmem:[%s981_s13 + $0x38] sm:$0xff]   ;;  %v582_v61 = vld [vmem:[%s982_s10] ss:$0 sm:$0xff] }
  0x47   :  { %658 = vmatpush3.bf16.msra.mxu1 %v704_v6 }
  0x48   :  { %v124_v2 = vpack.c.bf16 %v123_v1, %v122_v63  ;;  %659 = vmatprep.subr.bf16.mxu1 %v725_v0 }
  0x4a   :  { %648 = vmatmul.mubr.bf16.vlgmr.msra.gmra.mrb[0].mxu0 %v124_v2 }
  0x4b   :  { %687 = vmatprep.mubr.msk.bf16.mxu0 %vm726_vm0, %v725_v0  ;;  %660 = vmatpush3.bf16.msra.mxu1 %v705_v7 }
  0x4c   :  { %661 = vmatprep.subr.bf16.mxu1 %v725_v0  ;;  %672 = vmatpush3.bf16.msra.mxu0 %v709_v53 }
  0x4d   :  { %673 = vmatprep.subr.bf16.mxu0 %v725_v0 }
  0x4f   :  { %662 = vmatpush3.bf16.msra.mxu1 %v706_v8 }
  0x50   :  { %663 = vmatprep.subr.bf16.mxu1 %v725_v0  ;;  %674 = vmatpush3.bf16.msra.mxu0 %v710_v54 }
  0x51   :  { %675 = vmatprep.subr.bf16.mxu0 %v725_v0 }
  0x53   :  { %664 = vmatpush3.bf16.msra.mxu1 %v707_v9 }
  0x54   :  { %665 = vmatprep.subr.bf16.mxu1 %v725_v0  ;;  %676 = vmatpush3.bf16.msra.mxu0 %v711_v55 }
  0x55   :  { %677 = vmatprep.subr.bf16.mxu0 %v725_v0 }
  0x57   :  { %666 = vmatpush3.bf16.msra.mxu1 %v708_v10 }
  0x58   :  { %678 = vmatpush3.bf16.msra.mxu0 %v712_v56 }
  0x59   :  { %679 = vmatprep.subr.bf16.mxu0 %v725_v0 }
  0x5c   :  { %680 = vmatpush3.bf16.msra.mxu0 %v713_v57 }
  0x5d   :  { %681 = vmatprep.subr.bf16.mxu0 %v725_v0 }
  0x60   :  { %682 = vmatpush3.bf16.msra.mxu0 %v714_v58 }
  0x61   :  { %683 = vmatprep.subr.bf16.mxu0 %v725_v0 }
  0x64   :  { %684 = vmatpush3.bf16.msra.mxu0 %v715_v59 }
  0x65   :  { %685 = vmatprep.subr.bf16.mxu0 %v725_v0 }
  0x68   :  { %686 = vmatpush3.bf16.msra.mxu0 %v716_v60 }
 0x11d   :  { %v230_v12 = vpop.f32.mrb[0].mxu0 }
 0x11e   :  { %v231_v13 = vadd.f32 %v573_v11, %v230_v12  ;;  %v649_v14 = vpop.f32.mrb[1].mxu0 }
 0x11f   :  { %v233_v15 = vpop.f32.mrb[2].mxu0 }
 0x120   :  { %v237_v16 = vmax.f32 %v231_v13, 0.0  ;;  %v650_v17 = vpop.f32.mrb[3].mxu0 }
 0x122   :  { %v246_v18 = vrot.slane %v237_v16, 4  ;;  %v253_v19 = vmul.f32 %v237_v16, %v237_v16 }
 0x124   :  { %v247_v20 = vadd.f32 %v246_v18, %v237_v16  ;;  %v256_v21 = vrot.slane %v253_v19, 4 }
 0x126   :  { %v248_v22 = vrot.slane %v247_v20, 2  ;;  %v257_v23 = vadd.f32 %v256_v21, %v253_v19 }
 0x128   :  { %v249_v24 = vadd.f32 %v248_v22, %v247_v20  ;;  %v258_v25 = vrot.slane %v257_v23, 2 }
 0x12a   :  { %v250_v26 = vrot.slane %v249_v24, 1  ;;  %v259_v27 = vadd.f32 %v258_v25, %v257_v23  ;;  %v429_v23 = vld [vmem:[%s983_s11] sm:$0x1] }
 0x12c   :  { %v251_v28 = vadd.f32 %v250_v26, %v249_v24  ;;  %v260_v29 = vrot.slane %v259_v27, 1  ;;  %v433_v26 = vld [vmem:[%s984_s12] sm:$0x1] }
 0x12e   :  { %v252_v30 = vmul.f32 0.125, %v251_v28  ;;  %v261_v31 = vadd.f32 %v260_v29, %v259_v27 }
 0x130   :  { %v262_v32 = vmul.f32 0.125, %v261_v31  ;;  %v263_v33 = vmul.f32 %v252_v30, %v252_v30 }
 0x132   :  { %v264_v34 = vsub.f32 %v262_v32, %v263_v33 }
 0x134   :  { %v265_v35 = vmax.f32 %v264_v34, 0.0 }
 0x136   :  { %v267_v36 = vadd.f32 1e-05, %v265_v35 }
 0x138   :  { %721 = vrsqrt.f32 %v267_v36 }
 0x142   :  { %v722_v38 = vpop.eup %721 }
 0x143   :  { %v269_v39 = vmul.f32 %v722_v38, %v266_v37  ;;  %v591_v38 = vld [vmem:[%s985_s14] ss:$0 sm:$0xff] }
 0x145   :  { %v271_v41 = vmul.f32 %v269_v39, %v252_v30  ;;  %v273_v43 = vmul.f32 0.0, %v269_v39  ;;  %v279_v44 = vrot.slane %v269_v39, %v867_v52 }
 0x147   :  { %v272_v42 = vsub.f32 %v270_v40, %v271_v41  ;;  %v281_v46 = vmul.f32 %v279_v44, %v237_v16  ;;  %v282_v47 = vmul.f32 0.0, %v279_v44 }
 0x149   :  { %v274_v45 = vadd.f32 %v273_v43, %v272_v42 }
 0x14b   :  { %v287_v48 = vrot.slane %v274_v45, %v867_v52 }
 0x14d   :  { %v289_v49 = vadd.f32 %v287_v48, %v281_v46  ;;  %v290_v50 = vadd.f32 %v287_v48, %v282_v47 }
 0x14f   :  { %v291_v51 = vpack.c.bf16 %v290_v50, %v289_v49 }
 0x151   :  { %668 = vmatmul.mubr.bf16.vlgmr.msra.gmra.mrb[0].mxu1 %v291_v51 }
 0x224   :  { %v397_v62 = vpop.f32.mrb[0].mxu1 }
 0x225   :  { %v398_v63 = vadd.f32 %v582_v61, %v397_v62  ;;  %v669_v1 = vpop.f32.mrb[1].mxu1 }
 0x226   :  { %v400_v2 = vpop.f32.mrb[2].mxu1 }
 0x227   :  { %v404_v3 = vmax.f32 %v398_v63, 0.0  ;;  %v670_v4 = vpop.f32.mrb[3].mxu1 }
 0x229   :  { %v409_v5 = vrot.slane %v404_v3, 4  ;;  %v416_v6 = vmul.f32 %v404_v3, %v404_v3 }
 0x22b   :  { %v410_v7 = vadd.f32 %v409_v5, %v404_v3  ;;  %v419_v8 = vrot.slane %v416_v6, 4 }
 0x22d   :  { %v411_v9 = vrot.slane %v410_v7, 2  ;;  %v420_v10 = vadd.f32 %v419_v8, %v416_v6 }
 0x22f   :  { %v412_v11 = vadd.f32 %v411_v9, %v410_v7  ;;  %v421_v12 = vrot.slane %v420_v10, 2 }
 0x231   :  { %v413_v0 = vrot.slane %v412_v11, 1  ;;  %v422_v13 = vadd.f32 %v421_v12, %v420_v10 }
 0x233   :  { %v414_v14 = vadd.f32 %v413_v0, %v412_v11  ;;  %v423_v15 = vrot.slane %v422_v13, 1 }
 0x235   :  { %v415_v16 = vmul.f32 0.125, %v414_v14  ;;  %v424_v17 = vadd.f32 %v423_v15, %v422_v13 }
 0x237   :  { %v425_v18 = vmul.f32 0.125, %v424_v17  ;;  %v426_v19 = vmul.f32 %v415_v16, %v415_v16 }
 0x239   :  { %v427_v20 = vsub.f32 %v425_v18, %v426_v19 }
 0x23b   :  { %v428_v21 = vmax.f32 %v427_v20, 0.0 }
 0x23d   :  { %v430_v22 = vadd.f32 1e-05, %v428_v21 }
 0x23f   :  { %723 = vrsqrt.f32 %v430_v22 }
 0x249   :  { %v724_v24 = vpop.eup %723 }
 0x24a   :  { %v432_v25 = vmul.f32 %v724_v24, %v429_v23 }
 0x24c   :  { %v434_v27 = vmul.f32 %v432_v25, %v415_v16  ;;  %v442_v28 = vrot.slane %v432_v25, %v867_v52  ;;  %v436_v30 = vmul.f32 0.0, %v432_v25 }
 0x24e   :  { %v435_v29 = vsub.f32 %v433_v26, %v434_v27  ;;  %v444_v32 = vmul.f32 %v442_v28, %v404_v3  ;;  %v445_v33 = vmul.f32 0.0, %v442_v28 }
 0x250   :  { %v437_v31 = vadd.f32 %v436_v30, %v435_v29 }
 0x252   :  { %v450_v34 = vrot.slane %v437_v31, %v867_v52 }
 0x254   :  { %v452_v35 = vadd.f32 %v450_v34, %v444_v32  ;;  %v453_v36 = vadd.f32 %v450_v34, %v445_v33 }
 0x256   :  { %v454_v37 = vpack.c.bf16 %v453_v36, %v452_v35 }
 0x258   :  { %688 = vmatmul.mubr.bf16.vlgmr.msra.gmra.mrb[4].mxu0 %v454_v37 }
 0x32b   :  { %v560_v39 = vpop.f32.mrb[4].mxu0 }
 0x32c   :  { %v561_v40 = vadd.f32 %v591_v38, %v560_v39  ;;  %v689_v41 = vpop.f32.mrb[5].mxu0 }
 0x32d   :  { %v563_v42 = vpop.f32.mrb[6].mxu0 }
 0x32e   :  { %567 = vst [vmem:[%s986_s15] sm:$0xff] %v561_v40  ;;  %v564_v43 = vadd.f32 %v591_v38, %v563_v42  ;;  %v690_v44 = vpop.f32.mrb[7].mxu0 }
 0x330   :  { %568 = vst [vmem:[%s986_s15 + $0x8] sm:$0xff] %v564_v43 }

</bundles_post_ra>
